<compile_context>
chip_gen: v7x
topology: tpu7x:2x2x1
jax: 0.10.0
libtpu: 0.0.40
codegen_flags: <defaults>
</compile_context>

<pallas_src>
import jax
import jax.numpy as jnp
from jax.experimental import pallas as pl
from jax.experimental.pallas import tpu as pltpu

_NEG_SLOPE = 0.2          # max(y, slope*y) rewrite valid only for slope in (0, 1).
_DISCRIMINATOR = False    # dropout disabled, matching the module spec.

# Sizing knobs (see perf review).
_MAX_BLOCK_BYTES = 8 * 1024 * 1024    # 8 MiB blocks amortize ~0.35 us/step (esp. v7x)
_MIN_GRID_STEPS = 4                   # give megacore (v7x: 2 TCs) whole blocks
_BYPASS_BYTES = 1 * 1024 * 1024       # below this, fused jnp beats launch cost
_VMEM_LIMIT_BYTES = 48 * 1024 * 1024  # 2-buf in+out @ 8 MiB blocks + headroom; < v7x 64 MiB


def _residual_block_kernel(x_ref, o_ref):
    x = x_ref[...]
    y = x + x                                    # x += residual (identity shortcut)
    o_ref[...] = jnp.maximum(y, _NEG_SLOPE * y)  # LeakyReLU(0.2)


def _elementwise_ref(x):
    """Fused jnp fallback / reference: leaky_relu(2x, 0.2) in the input dtype."""
    y = x + x
    return jnp.maximum(y, _NEG_SLOPE * y)


def _choose_lane_width(total, max_lane=8192):
    """Widest multiple of 128 (<= max_lane) that divides the element count."""
    best = None
    c = 128
    limit = min(max_lane, total)
    while c <= limit:
        if total % c == 0:
            best = c
        c += 128
    return best


def _choose_block_rows(rows, row_bytes, sub_mult):
    """Pick a block row count that
      - is a multiple of the sublane packing (8 f32 / 16 bf16 / 32 int8),
      - keeps the block <= _MAX_BLOCK_BYTES,
      - leaves >= _MIN_GRID_STEPS grid steps when the array is big enough,
      - and divides `rows` exactly when possible (no ragged last block)."""
    if rows <= sub_mult:
        return rows  # full-extent block: exempt from the (8,128) rule
    cap_rows = max(sub_mult, (_MAX_BLOCK_BYTES // row_bytes) // sub_mult * sub_mult)
    split_rows = max(sub_mult, (rows // _MIN_GRID_STEPS) // sub_mult * sub_mult)
    target = min(cap_rows, split_rows, rows)
    target = max(sub_mult, (target // sub_mult) * sub_mult)
    # Prefer an exact divisor of rows (avoids masked partial stores on the last step).
    cand, tries = target, 0
    while cand >= sub_mult and tries < 4096:
        if rows % cand == 0:
            return cand
        cand -= sub_mult
        tries += 1
    return min(target, rows)  # ragged last block; Pallas masks it (correct, slightly slower)


def _pallas_leaky_double_2d(flat2d):
    """Run the elementwise kernel over a lane-dense (R, C) slab (C % 128 == 0)."""
    R, C = flat2d.shape
    itemsize = jnp.dtype(flat2d.dtype).itemsize
    sub_mult = 8 if itemsize >= 4 else 32 // itemsize  # f32: 8, bf16: 16, int8/fp8: 32
    block_r = _choose_block_rows(R, C * itemsize, sub_mult)
    grid_r = pl.cdiv(R, block_r)

    return pl.pallas_call(
        _residual_block_kernel,
        out_shape=jax.ShapeDtypeStruct((R, C), flat2d.dtype),
        grid_spec=pltpu.PrefetchScalarGridSpec(
            num_scalar_prefetch=0,
            grid=(grid_r,),
            in_specs=[pl.BlockSpec((block_r, C), lambda i: (i, 0))],
            out_specs=pl.BlockSpec((block_r, C), lambda i: (i, 0)),
        ),
        compiler_params=pltpu.CompilerParams(
            dimension_semantics=("parallel",),        # shard grid across TCs (v7x megacore)
            vmem_limit_bytes=_VMEM_LIMIT_BYTES,
        ),
    )(flat2d)


def _pallas_flat(flat1d):
    """Run the kernel on a 1-D array whose length is a multiple of 128."""
    n = flat1d.shape[0]
    lane = _choose_lane_width(n)
    return _pallas_leaky_double_2d(flat1d.reshape(n // lane, lane)).reshape(-1)


def residual_block_forward(x, in_channels=None, out_channels=None, *, force_pallas=False):
    """Pallas implementation of ResidualBlock.forward for NCHW (float) input x.

    in_channels / out_channels only gate the (Identity) shortcut in the spec,
    which is a no-op either way, so they never change the math. Dropout is
    skipped because DISCRIMINATOR is False.
    """
    del in_channels, out_channels
    orig_shape = x.shape
    total = x.size
    if total == 0:
        return x
    total_bytes = total * jnp.dtype(x.dtype).itemsize

    # Tiny activations: pallas_call launch cost dominates; XLA fuses this for free.
    if not force_pallas and total_bytes < _BYPASS_BYTES:
        return _elementwise_ref(x)

    lane = _choose_lane_width(total)
    if lane is not None:
        # Fast path: zero-copy reshape to a lane-dense slab.
        return _pallas_leaky_double_2d(x.reshape(total // lane, lane)).reshape(orig_shape)

    # Ragged total (no multiple-of-128 divisor): kernel on the largest
    # 128-aligned prefix, tiny (<128 elem) tail via fused jnp, one concat.
    flat = x.reshape(-1)
    n_main = (total // 128) * 128
    if n_main == 0:
        return _elementwise_ref(x)
    main = _pallas_flat(flat[:n_main])
    tail = _elementwise_ref(flat[n_main:])
    return jnp.concatenate([main, tail]).reshape(orig_shape)


def _ref(x):
    return jax.nn.leaky_relu(x + x, negative_slope=_NEG_SLOPE)


if __name__ == "__main__":
    key = jax.random.PRNGKey(0)
    k0, k1, k2, k3 = jax.random.split(key, 4)

    # Small NCHW input consistent with the module: batch=2, channels=4, 16x16.
    # force_pallas=True so the Pallas kernel itself is exercised despite the
    # small-input bypass.
    x = jax.random.normal(k0, (2, 4, 16, 16), dtype=jnp.float32)
    out = jax.block_until_ready(residual_block_forward(x, 4, 4, force_pallas=True))
    assert out.shape == x.shape
    assert jnp.allclose(out, _ref(x), atol=1e-6), "f32 mismatch vs reference"

    # Auto path (bypass) must agree too.
    out_auto = jax.block_until_ready(residual_block_forward(x, 4, 4))
    assert jnp.allclose(out_auto, _ref(x), atol=1e-6), "bypass mismatch vs reference"

    # bf16 input: compute stays in bf16 (halves HBM traffic).
    xb = jax.random.normal(k1, (2, 8, 32, 32), dtype=jnp.bfloat16)
    outb = jax.block_until_ready(residual_block_forward(xb, 8, 8, force_pallas=True))
    assert outb.dtype == jnp.bfloat16
    assert jnp.allclose(outb.astype(jnp.float32),
                        _ref(xb).astype(jnp.float32), atol=1e-2), "bf16 mismatch"

    # Ragged size (not a multiple of 128): exercises the prefix + jnp-tail path.
    xr = jax.random.normal(k2, (3, 5, 7, 11), dtype=jnp.float32)
    outr = jax.block_until_ready(residual_block_forward(xr, 5, 5, force_pallas=True))
    assert outr.shape == xr.shape
    assert jnp.allclose(outr, _ref(xr), atol=1e-6), "ragged mismatch vs reference"

    # Medium activation (4 MiB): exercises the multi-step pipelined grid
    # (exact-divisor blocks, >= 4 grid steps for megacore sharding).
    xm = jax.random.normal(k3, (2, 8, 256, 256), dtype=jnp.float32)
    outm = jax.block_until_ready(residual_block_forward(xm, 8, 8))
    assert outm.shape == xm.shape
    assert jnp.allclose(outm, _ref(xm), atol=1e-6), "medium mismatch vs reference"

    print("KERNEL_OK")
</pallas_src>

<mosaic_0001>
module attributes {stable_mosaic.version = 11 : i64} {
  func.func @_residual_block_kernel(%arg0: i32, %arg1: memref<1x2048xf32, #tpu.memory_space<vmem>>, %arg2: memref<1x2048xf32, #tpu.memory_space<vmem>>) attributes {dimension_semantics = [#tpu.dimension_semantics<parallel>], iteration_bounds = array<i64: 1>, scalar_prefetch = 0 : i64, scratch_operands = 0 : i64, tpu.core_type = #tpu.core_type<tc>, window_params = [{transform_indices = @transform_0, window_bounds = array<i64: 1, 2048>}, {transform_indices = @transform_1, window_bounds = array<i64: 1, 2048>}]} {
    %c0 = arith.constant 0 : index
    %c0_0 = arith.constant 0 : index
    %0 = vector.load %arg1[%c0, %c0_0] : memref<1x2048xf32, #tpu.memory_space<vmem>>, vector<1x2048xf32>
    %1 = arith.addf %0, %0 : vector<1x2048xf32>
    %cst = arith.constant 2.000000e-01 : f32
    %2 = vector.broadcast %cst : f32 to vector<1x2048xf32>
    %3 = arith.mulf %2, %1 : vector<1x2048xf32>
    %4 = arith.maximumf %1, %3 : vector<1x2048xf32>
    %c0_1 = arith.constant 0 : index
    %c0_2 = arith.constant 0 : index
    %5 = vector.load %arg2[%c0_1, %c0_2] : memref<1x2048xf32, #tpu.memory_space<vmem>>, vector<1x2048xf32>
    tpu.vector_store %arg2[%c0_1, %c0_2], %4 {strides = array<i32>} : memref<1x2048xf32, #tpu.memory_space<vmem>>, vector<1x2048xf32>,
    return
  }
  func.func @transform_0(%arg0: i32) -> (i32, i32) {
    %c0_i32 = arith.constant 0 : i32
    %c0_i32_0 = arith.constant 0 : i32
    return %arg0, %c0_i32 : i32, i32
  }
  func.func @transform_1(%arg0: i32) -> (i32, i32) {
    %c0_i32 = arith.constant 0 : i32
    %c0_i32_0 = arith.constant 0 : i32
    return %arg0, %c0_i32 : i32, i32
  }
}

</mosaic_0001>

<bundles_post_ra>
// kernel: tpu_custom_call.1
= control target key start
LH: loop header
LB: loop body
LE: loop exit
PB: predicated region body
PF: predicated region fallthrough
CT: control target
= control target key end

     0   :  { %6 = vsyncpa [#allocation3], 0  ;;  %s132_s0 = inlined_call_operand.hbm [shape: f32[1,2048], index: 0, kind: input, shape index: {}]   ;;  %s133_s1 = inlined_call_operand.hbm [shape: f32[1,2048], index: 1, kind: output, shape index: {}]  }
   0x1   :  { %7 = vsyncpa [#allocation4], 0  ;;  %s96_s6 = smov [#allocation2]   ;;  %s48_s10 = scalar_lea.hbm %s132_s0, 256 }
   0x2   :  { %s14_s7 = sshll.u32 %s96_s6, 4  ;;  %p49_p0 = scmp.ne.s32.totalorder %s132_s0, %s48_s10  ;;  %s15_s7 = int_to_ptr.vmem [resolvable:$true] %s14_s7 }
   0x3   :  { %p52_p1 = scmp.lt.u32.totalorder %s48_s10, %s132_s0 }
   0x5   :  { %p54_p2 = pnand %p52_p1, %p49_p0 }
   0x7   :  { %57 = shalt.err (!%p54_p2)
}
   0x8   :  { %s58_s15 = scalar_lea.vmem %s15_s7, 256  ;;  %p63_p4 = scmp.lt.s32.totalorder %s15_s7, %s15_s7 }
   0x9   :  { %p59_p3 = scmp.ne.s32.totalorder %s15_s7, %s58_s15  ;;  %p64_p5 = scmp.lt.s32.totalorder %s58_s15, %s58_s15 }
   0xb   :  { %p65_p6 = por %p64_p5, %p63_p4 }
   0xd   :  { %p66_p7 = pnand %p65_p6, %p59_p3 }
   0xf   :  { %69 = shalt.err (!%p66_p7)
}
  0x10   :  { %17 = dma.hbm_to_vmem [thread:$0]  %s132_s0, 256, %s15_s7, [#allocation3]  }
  0x11   :  { %92 = dma.done.wait [#allocation3], 256  }
  0x12   :  { %93 = vsyncadd [#allocation3], 4294967040  ;;  %v21_v0 = vld [vmem:[#allocation2] sm:$0xff]  ;;  %v22_v1 = vld [vmem:[#allocation2 + $0x8] sm:$0xff]  ;;  %s97_s18 = smov [#allocation5]  }
  0x13   :  { %v23_v2 = vadd.f32 %v21_v0, %v21_v0  ;;  %v24_v3 = vadd.f32 %v22_v1, %v22_v1  ;;  %s37_s19 = sshll.u32 %s97_s18, 4  ;;  %s38_s19 = int_to_ptr.vmem [resolvable:$true] %s37_s19 }
  0x14   :  { %s70_s20 = scalar_lea.vmem %s38_s19, 256  ;;  %p75_p9 = scmp.lt.s32.totalorder %s38_s19, %s38_s19 }
  0x15   :  { %v25_v4 = vmul.f32 0.2, %v23_v2  ;;  %v26_v5 = vmul.f32 0.2, %v24_v3  ;;  %p71_p8 = scmp.ne.s32.totalorder %s38_s19, %s70_s20  ;;  %p76_p10 = scmp.lt.s32.totalorder %s70_s20, %s70_s20 }
  0x17   :  { %v27_v6 = vmax.f32 %v23_v2, %v25_v4  ;;  %v28_v7 = vmax.f32 %v24_v3, %v26_v5  ;;  %p77_p11 = por %p76_p10, %p75_p9 }
  0x19   :  { %29 = vst [vmem:[#allocation5] sm:$0xff] %v27_v6  ;;  %30 = vst [vmem:[#allocation5 + $0x8] sm:$0xff] %v28_v7  ;;  %p78_p12 = pnand %p77_p11, %p71_p8 }
  0x1b   :  { %81 = shalt.err (!%p78_p12)
}
  0x1c   :  { %s82_s22 = scalar_lea.hbm %s133_s1, 256 }
  0x1d   :  { %p83_p13 = scmp.ne.s32.totalorder %s133_s1, %s82_s22  ;;  %p86_p0 = scmp.lt.u32.totalorder %s82_s22, %s133_s1 }
  0x1f   :  { %p88_p1 = pnand %p86_p0, %p83_p13 }
  0x21   :  { %91 = shalt.err (!%p88_p1)
}
  0x22   :  { %40 = dma.vmem_to_hbm [thread:$0]  %s38_s19, 256, %s133_s1, [#allocation4]  }
  0x23   :  { %94 = dma.done.wait [#allocation4], 256  }
  0x24   :  { %95 = vsyncadd [#allocation4], 4294967040 }
  0x25   :  { %44 = vsyncpa [#allocation3], 1 }
  0x26   :  { %45 = vsyncpa [#allocation4], 1 }

</bundles_post_ra>
